<compile_context>
chip_gen: v5e
topology: v5e:2x2
jax: 0.10.0
libtpu: 0.0.40
codegen_flags: <defaults>
</compile_context>

<pallas_src>
import functools
import math

import jax
import jax.numpy as jnp
from jax.experimental import pallas as pl
from jax.experimental.pallas import tpu as pltpu

LN_EPS = 1e-5  # torch.nn.LayerNorm default

PARAM_ORDER = ("ln1_g", "ln1_b", "wqkv", "bqkv", "wo", "bo",
               "ln2_g", "ln2_b", "w1", "b1", "w2", "b2")
_BF16_WEIGHTS = ("wqkv", "wo", "w1", "w2")


def _layernorm(x, gamma, beta):
    # two-pass (centered) variance: more robust than E[x^2]-E[x]^2 in fp32
    m = jnp.mean(x, axis=-1, keepdims=True)
    xc = x - m
    var = jnp.mean(xc * xc, axis=-1, keepdims=True)
    return xc * jax.lax.rsqrt(var + LN_EPS) * gamma + beta


# ---------------------------------------------------------------------------
# One fused kernel: grid = (batch_tiles, depth).  Depth is the inner, sequential
# axis; activations for the current batch tile are carried in a VMEM scratch.
# ---------------------------------------------------------------------------
def transformer_kernel(x_ref,
                       ln1g_ref, ln1b_ref, wqkv_ref, bqkv_ref, wo_ref, bo_ref,
                       ln2g_ref, ln2b_ref, w1_ref, b1_ref, w2_ref, b2_ref,
                       out_ref, attn_ref, x_vmem,
                       *, heads, qk_dim, v_dim, batch_tile, tokens):
    layer = pl.program_id(1)
    n_layers = pl.num_programs(1)
    TB, N = batch_tile, tokens
    rows = TB * N
    D = x_ref.shape[-1]
    HQ = heads * qk_dim
    scale = 1.0 / math.sqrt(qk_dim)
    bf16 = jnp.bfloat16

    @pl.when(layer == 0)
    def _():
        # load this batch tile's activations once per depth loop
        x_vmem[...] = x_ref[...].reshape(rows, D).astype(jnp.float32)

    x = x_vmem[...]                                        # (rows, D) fp32

    # ---- x + SoftmaxAttention(LayerNorm(x)) ----
    xn = _layernorm(x, ln1g_ref[0, 0], ln1b_ref[0, 0])
    # one fused QKV matmul: bf16 operands, fp32 accumulation, fp32 bias add
    qkv = jnp.dot(xn.astype(bf16), wqkv_ref[0],
                  preferred_element_type=jnp.float32) + bqkv_ref[0, 0]

    def split_heads(off, d):
        # (rows, H*d) lane-slices -> batched (heads*TB, N, d)
        parts = [qkv[:, off + h * d: off + (h + 1) * d].reshape(TB, N, d)
                 for h in range(heads)]
        return jnp.stack(parts, axis=0).reshape(heads * TB, N, d)

    qh = split_heads(0, qk_dim)                            # (H*TB, N, dq) fp32
    kh = split_heads(HQ, qk_dim)
    vh = split_heads(2 * HQ, v_dim)                        # (H*TB, N, dv)

    # all heads through one score matmul + ONE softmax
    s = jnp.einsum("bqd,bkd->bqk", qh.astype(bf16), kh.astype(bf16),
                   preferred_element_type=jnp.float32) * scale   # (H*TB, N, N)
    s = s - jnp.max(s, axis=-1, keepdims=True)
    e = jnp.exp(s)
    a = e * pl.reciprocal(jnp.sum(e, axis=-1, keepdims=True), approx=True)

    @pl.when(layer == n_layers - 1)                        # only last layer's info is used
    def _():
        attn_ref[...] = a.reshape(heads, TB, N, N)

    o = jnp.einsum("bqk,bkd->bqd", a.astype(bf16), vh.astype(bf16),
                   preferred_element_type=jnp.float32)     # (H*TB, N, dv) fp32
    o = o.reshape(heads, rows, v_dim)
    # concat heads along the feature dim -> single output projection matmul
    o_cat = jnp.concatenate([o[h] for h in range(heads)], axis=-1)   # (rows, H*dv)
    x = x + jnp.dot(o_cat.astype(bf16), wo_ref[0],
                    preferred_element_type=jnp.float32) + bo_ref[0, 0]

    # ---- x + FeedForward(LayerNorm(x)) ----
    xn2 = _layernorm(x, ln2g_ref[0, 0], ln2b_ref[0, 0])
    h1 = jnp.dot(xn2.astype(bf16), w1_ref[0],
                 preferred_element_type=jnp.float32) + b1_ref[0, 0]
    # exact GELU (torch.nn.GELU default)
    h1 = 0.5 * h1 * (1.0 + jax.lax.erf(h1 * (1.0 / math.sqrt(2.0))))
    x = x + jnp.dot(h1.astype(bf16), w2_ref[0],
                    preferred_element_type=jnp.float32) + b2_ref[0, 0]

    x_vmem[...] = x                                        # carry to next layer
    out_ref[...] = x.reshape(TB, N, D).astype(out_ref.dtype)


def _vmem_limit_bytes():
    # v5e/v6e: 128 MiB physical -> 96 MiB scoped; v7x: 64 MiB -> 48 MiB.
    try:
        phys = int(pltpu.get_tpu_info().vmem_capacity_bytes)
    except Exception:
        phys = 64 * 1024 * 1024
    return min((phys * 3) // 4, 100 * 1024 * 1024)


# ---------------------------------------------------------------------------
# Wrapper: single pallas_call for the whole transformer
# ---------------------------------------------------------------------------
def transformer_forward(x, params, *, heads, qk_dim, v_dim, batch_tile=None):
    B, N, D = x.shape
    depth = params["wqkv"].shape[0]
    M = params["w1"].shape[-1]
    if batch_tile is None:
        # ~2 batch tiles: feeds both v7x TensorCores without re-streaming weights
        # more than 2x (no effect on single-core v5e/v6e).
        batch_tile = B // 2 if B % 2 == 0 else B
    TB = batch_tile
    assert B % TB == 0
    n_btiles = B // TB

    # matmul weights go to HBM as bf16 (halves weight DMA); biases / LN stay fp32
    plist = [params[k].astype(jnp.bfloat16) if k in _BF16_WEIGHTS else params[k]
             for k in PARAM_ORDER]

    def wspec(arr):
        nd = arr.ndim
        return pl.BlockSpec((1,) + tuple(arr.shape[1:]),
                            lambda b, d: (d,) + (0,) * (nd - 1))

    x_spec = pl.BlockSpec((TB, N, D), lambda b, d: (b, 0, 0))
    out_spec = pl.BlockSpec((TB, N, D), lambda b, d: (b, 0, 0))
    attn_spec = pl.BlockSpec((heads, TB, N, N), lambda b, d: (0, b, 0, 0))

    # Advisory cost estimate (helps XLA schedule around the custom call).
    BN = B * N
    qkv_w = heads * (2 * qk_dim + v_dim)
    flops_layer = (2 * BN * D * qkv_w
                   + 2 * B * heads * N * N * (qk_dim + v_dim)
                   + 2 * BN * heads * v_dim * D
                   + 4 * BN * D * M)
    trans_layer = B * heads * N * N + BN * M + 2 * BN + B * heads * N
    param_bytes = sum(int(a.size) * a.dtype.itemsize for a in plist)
    bytes_accessed = (2 * BN * D * x.dtype.itemsize
                      + heads * B * N * N * 4
                      + n_btiles * param_bytes)
    cost = pl.CostEstimate(flops=int(depth * flops_layer),
                           transcendentals=int(depth * trans_layer),
                           bytes_accessed=int(bytes_accessed))

    kern = functools.partial(transformer_kernel, heads=heads, qk_dim=qk_dim,
                             v_dim=v_dim, batch_tile=TB, tokens=N)

    out, attn = pl.pallas_call(
        kern,
        out_shape=(jax.ShapeDtypeStruct((B, N, D), x.dtype),
                   jax.ShapeDtypeStruct((heads, B, N, N), jnp.float32)),
        grid=(n_btiles, depth),                       # (parallel batch, sequential layers)
        in_specs=[x_spec] + [wspec(a) for a in plist],
        out_specs=(out_spec, attn_spec),
        scratch_shapes=[pltpu.VMEM((TB * N, D), jnp.float32)],   # activations across layers
        compiler_params=pltpu.CompilerParams(
            dimension_semantics=("parallel", "arbitrary"),
            vmem_limit_bytes=_vmem_limit_bytes()),
        cost_estimate=cost,
    )(x, *plist)

    info = jnp.transpose(attn, (1, 0, 2, 3))          # (B, heads, N, N)
    return out, info


# ---------------------------------------------------------------------------
# Parameter init: all layers stacked along a leading `depth` axis.
# QKV fused as (depth, D, H*(2*dq+dv)) laid out [Q heads | K heads | V heads];
# output projection as (depth, H*dv, D); matmul weights in bf16, biases/LN fp32.
# ---------------------------------------------------------------------------
def init_params(key, depth, dim, heads, qk_dim, v_dim, mlp_dim):
    ks = jax.random.split(key, 12)

    def uni(k, shape, fan_in, dtype=jnp.float32):
        lim = 1.0 / math.sqrt(fan_in)
        return jax.random.uniform(k, shape, jnp.float32, -lim, lim).astype(dtype)

    wq_width = heads * qk_dim
    wv_width = heads * v_dim
    qkv_width = 2 * wq_width + wv_width
    bf16 = jnp.bfloat16
    return dict(
        ln1_g=(1.0 + 0.01 * jax.random.normal(ks[0], (depth, 1, dim))).astype(jnp.float32),
        ln1_b=(0.01 * jax.random.normal(ks[1], (depth, 1, dim))).astype(jnp.float32),
        wqkv=uni(ks[2], (depth, dim, qkv_width), dim, bf16),
        bqkv=uni(ks[3], (depth, 1, qkv_width), dim),
        wo=uni(ks[4], (depth, wv_width, dim), wv_width, bf16),
        bo=uni(ks[5], (depth, 1, dim), wv_width),
        ln2_g=(1.0 + 0.01 * jax.random.normal(ks[6], (depth, 1, dim))).astype(jnp.float32),
        ln2_b=(0.01 * jax.random.normal(ks[7], (depth, 1, dim))).astype(jnp.float32),
        w1=uni(ks[8], (depth, dim, mlp_dim), dim, bf16),
        b1=uni(ks[9], (depth, 1, mlp_dim), dim),
        w2=uni(ks[10], (depth, mlp_dim, dim), mlp_dim, bf16),
        b2=uni(ks[11], (depth, 1, dim), mlp_dim),
    )


if __name__ == "__main__":
    # small, forward-consistent shapes
    B, N = 2, 8
    dim, depth, heads, qk_dim, v_dim, mlp_dim = 32, 2, 2, 16, 16, 64

    key = jax.random.PRNGKey(0)
    kx, kp = jax.random.split(key)
    x = jax.random.normal(kx, (B, N, dim), jnp.float32)    # layout: [B, N, D]
    params = init_params(kp, depth, dim, heads, qk_dim, v_dim, mlp_dim)

    fwd = jax.jit(functools.partial(transformer_forward,
                                    heads=heads, qk_dim=qk_dim, v_dim=v_dim))
    out, info = fwd(x, params)
    jax.block_until_ready(out)
    jax.block_until_ready(info)

    assert out.shape == (B, N, dim)
    assert info.shape == (B, heads, N, N)
    assert bool(jnp.all(jnp.isfinite(out)))
    assert bool(jnp.all(jnp.isfinite(info)))
    print("KERNEL_OK")
</pallas_src>

<mosaic_0001>
module attributes {stable_mosaic.version = 11 : i64} {
  func.func @transformer_kernel(%arg0: i32, %arg1: i32, %arg2: memref<1x8x32xf32, #tpu.memory_space<vmem>>, %arg3: memref<1x1x32xf32, #tpu.memory_space<vmem>>, %arg4: memref<1x1x32xf32, #tpu.memory_space<vmem>>, %arg5: memref<1x32x96xbf16, #tpu.memory_space<vmem>>, %arg6: memref<1x1x96xf32, #tpu.memory_space<vmem>>, %arg7: memref<1x32x32xbf16, #tpu.memory_space<vmem>>, %arg8: memref<1x1x32xf32, #tpu.memory_space<vmem>>, %arg9: memref<1x1x32xf32, #tpu.memory_space<vmem>>, %arg10: memref<1x1x32xf32, #tpu.memory_space<vmem>>, %arg11: memref<1x32x64xbf16, #tpu.memory_space<vmem>>, %arg12: memref<1x1x64xf32, #tpu.memory_space<vmem>>, %arg13: memref<1x64x32xbf16, #tpu.memory_space<vmem>>, %arg14: memref<1x1x32xf32, #tpu.memory_space<vmem>>, %arg15: memref<1x8x32xf32, #tpu.memory_space<vmem>>, %arg16: memref<2x1x8x8xf32, #tpu.memory_space<vmem>>, %arg17: memref<8x32xf32, #tpu.memory_space<vmem>>) attributes {dimension_semantics = [#tpu.dimension_semantics<parallel>, #tpu.dimension_semantics<arbitrary>], iteration_bounds = array<i64: 2, 2>, scalar_prefetch = 0 : i64, scratch_operands = 1 : i64, tpu.core_type = #tpu.core_type<tc>, window_params = [{transform_indices = @transform_0, window_bounds = array<i64: 1, 8, 32>}, {transform_indices = @transform_1, window_bounds = array<i64: 1, 1, 32>}, {transform_indices = @transform_2, window_bounds = array<i64: 1, 1, 32>}, {transform_indices = @transform_3, window_bounds = array<i64: 1, 32, 96>}, {transform_indices = @transform_4, window_bounds = array<i64: 1, 1, 96>}, {transform_indices = @transform_5, window_bounds = array<i64: 1, 32, 32>}, {transform_indices = @transform_6, window_bounds = array<i64: 1, 1, 32>}, {transform_indices = @transform_7, window_bounds = array<i64: 1, 1, 32>}, {transform_indices = @transform_8, window_bounds = array<i64: 1, 1, 32>}, {transform_indices = @transform_9, window_bounds = array<i64: 1, 32, 64>}, {transform_indices = @transform_10, window_bounds = array<i64: 1, 1, 64>}, {transform_indices = @transform_11, window_bounds = array<i64: 1, 64, 32>}, {transform_indices = @transform_12, window_bounds = array<i64: 1, 1, 32>}, {transform_indices = @transform_13, window_bounds = array<i64: 1, 8, 32>}, {transform_indices = @transform_14, window_bounds = array<i64: 2, 1, 8, 8>}]} {
    %c0_i32 = arith.constant 0 : i32
    %0 = arith.cmpi eq, %arg1, %c0_i32 : i32
    %1 = arith.extui %0 : i1 to i32
    %c0_i32_0 = arith.constant 0 : i32
    %2 = arith.cmpi ne, %1, %c0_i32_0 : i32
    scf.if %2 {
      %c0_65 = arith.constant 0 : index
      %c0_66 = arith.constant 0 : index
      %c0_67 = arith.constant 0 : index
      %155 = vector.load %arg2[%c0_65, %c0_66, %c0_67] : memref<1x8x32xf32, #tpu.memory_space<vmem>>, vector<1x8x32xf32>
      %156 = vector.shape_cast %155 : vector<1x8x32xf32> to vector<8x32xf32>
      %c0_68 = arith.constant 0 : index
      %c0_69 = arith.constant 0 : index
      %157 = vector.load %arg17[%c0_68, %c0_69] : memref<8x32xf32, #tpu.memory_space<vmem>>, vector<8x32xf32>
      tpu.vector_store %arg17[%c0_68, %c0_69], %156 {strides = array<i32>} : memref<8x32xf32, #tpu.memory_space<vmem>>, vector<8x32xf32>,
    } else {
    }
    %c0 = arith.constant 0 : index
    %c0_1 = arith.constant 0 : index
    %3 = vector.load %arg17[%c0, %c0_1] : memref<8x32xf32, #tpu.memory_space<vmem>>, vector<8x32xf32>
    %c0_2 = arith.constant 0 : index
    %c0_3 = arith.constant 0 : index
    %c0_4 = arith.constant 0 : index
    %4 = vector.load %arg3[%c0_2, %c0_3, %c0_4] : memref<1x1x32xf32, #tpu.memory_space<vmem>>, vector<1x1x32xf32>
    %5 = vector.shape_cast %4 : vector<1x1x32xf32> to vector<32xf32>
    %c0_5 = arith.constant 0 : index
    %c0_6 = arith.constant 0 : index
    %c0_7 = arith.constant 0 : index
    %6 = vector.load %arg4[%c0_5, %c0_6, %c0_7] : memref<1x1x32xf32, #tpu.memory_space<vmem>>, vector<1x1x32xf32>
    %7 = vector.shape_cast %6 : vector<1x1x32xf32> to vector<32xf32>
    %cst = arith.constant dense<0.000000e+00> : vector<8xf32>
    %8 = vector.multi_reduction <add>, %3, %cst [1] : vector<8x32xf32> to vector<8xf32>
    %9 = vector.shape_cast %8 : vector<8xf32> to vector<8x1xf32>
    %cst_8 = arith.constant 3.200000e+01 : f32
    %10 = vector.broadcast %cst_8 : f32 to vector<8x1xf32>
    %11 = arith.divf %9, %10 : vector<8x1xf32>
    %12 = vector.broadcast %11 : vector<8x1xf32> to vector<8x32xf32>
    %13 = arith.subf %3, %12 : vector<8x32xf32>
    %14 = arith.mulf %13, %13 : vector<8x32xf32>
    %cst_9 = arith.constant dense<0.000000e+00> : vector<8xf32>
    %15 = vector.multi_reduction <add>, %14, %cst_9 [1] : vector<8x32xf32> to vector<8xf32>
    %16 = vector.shape_cast %15 : vector<8xf32> to vector<8x1xf32>
    %cst_10 = arith.constant 3.200000e+01 : f32
    %17 = vector.broadcast %cst_10 : f32 to vector<8x1xf32>
    %18 = arith.divf %16, %17 : vector<8x1xf32>
    %cst_11 = arith.constant 9.99999974E-6 : f32
    %19 = vector.broadcast %cst_11 : f32 to vector<8x1xf32>
    %20 = arith.addf %18, %19 : vector<8x1xf32>
    %21 = math.rsqrt %20 : vector<8x1xf32>
    %22 = vector.broadcast %21 : vector<8x1xf32> to vector<8x32xf32>
    %23 = arith.mulf %13, %22 : vector<8x32xf32>
    %24 = vector.shape_cast %5 : vector<32xf32> to vector<1x32xf32>
    %25 = vector.broadcast %24 : vector<1x32xf32> to vector<8x32xf32>
    %26 = arith.mulf %23, %25 : vector<8x32xf32>
    %27 = vector.shape_cast %7 : vector<32xf32> to vector<1x32xf32>
    %28 = vector.broadcast %27 : vector<1x32xf32> to vector<8x32xf32>
    %29 = arith.addf %26, %28 : vector<8x32xf32>
    %30 = arith.truncf %29 : vector<8x32xf32> to vector<8x32xbf16>
    %c0_12 = arith.constant 0 : index
    %c0_13 = arith.constant 0 : index
    %c0_14 = arith.constant 0 : index
    %31 = vector.load %arg5[%c0_12, %c0_13, %c0_14] : memref<1x32x96xbf16, #tpu.memory_space<vmem>>, vector<1x32x96xbf16>
    %32 = vector.shape_cast %31 : vector<1x32x96xbf16> to vector<32x96xbf16>
    %cst_15 = arith.constant dense<0.000000e+00> : vector<8x96xf32>
    %33 = tpu.matmul %30, %32, %cst_15 {dimension_numbers = #tpu.dot_dimension_numbers<[1], [0], [0], [1], [0, 0, 1, 1], [], []>} : vector<8x32xbf16>, vector<32x96xbf16>, vector<8x96xf32> -> vector<8x96xf32>
    %c0_16 = arith.constant 0 : index
    %c0_17 = arith.constant 0 : index
    %c0_18 = arith.constant 0 : index
    %34 = vector.load %arg6[%c0_16, %c0_17, %c0_18] : memref<1x1x96xf32, #tpu.memory_space<vmem>>, vector<1x1x96xf32>
    %35 = vector.shape_cast %34 : vector<1x1x96xf32> to vector<96xf32>
    %36 = vector.shape_cast %35 : vector<96xf32> to vector<1x96xf32>
    %37 = vector.broadcast %36 : vector<1x96xf32> to vector<8x96xf32>
    %38 = arith.addf %33, %37 : vector<8x96xf32>
    %39 = vector.extract_strided_slice %38 {offsets = [0, 0], sizes = [8, 16], strides = [1, 1]} : vector<8x96xf32> to vector<8x16xf32>
    %40 = vector.shape_cast %39 : vector<8x16xf32> to vector<1x8x16xf32>
    %41 = vector.extract_strided_slice %38 {offsets = [0, 16], sizes = [8, 16], strides = [1, 1]} : vector<8x96xf32> to vector<8x16xf32>
    %42 = vector.shape_cast %41 : vector<8x16xf32> to vector<1x8x16xf32>
    %43 = vector.shape_cast %40 : vector<1x8x16xf32> to vector<1x1x8x16xf32>
    %44 = vector.shape_cast %42 : vector<1x8x16xf32> to vector<1x1x8x16xf32>
    %45 = tpu.concatenate %43, %44 in 0 : vector<1x1x8x16xf32>, vector<1x1x8x16xf32> -> vector<2x1x8x16xf32>
    %46 = vector.shape_cast %45 : vector<2x1x8x16xf32> to vector<2x8x16xf32>
    %47 = vector.extract_strided_slice %38 {offsets = [0, 32], sizes = [8, 16], strides = [1, 1]} : vector<8x96xf32> to vector<8x16xf32>
    %48 = vector.shape_cast %47 : vector<8x16xf32> to vector<1x8x16xf32>
    %49 = vector.extract_strided_slice %38 {offsets = [0, 48], sizes = [8, 16], strides = [1, 1]} : vector<8x96xf32> to vector<8x16xf32>
    %50 = vector.shape_cast %49 : vector<8x16xf32> to vector<1x8x16xf32>
    %51 = vector.shape_cast %48 : vector<1x8x16xf32> to vector<1x1x8x16xf32>
    %52 = vector.shape_cast %50 : vector<1x8x16xf32> to vector<1x1x8x16xf32>
    %53 = tpu.concatenate %51, %52 in 0 : vector<1x1x8x16xf32>, vector<1x1x8x16xf32> -> vector<2x1x8x16xf32>
    %54 = vector.shape_cast %53 : vector<2x1x8x16xf32> to vector<2x8x16xf32>
    %55 = vector.extract_strided_slice %38 {offsets = [0, 64], sizes = [8, 16], strides = [1, 1]} : vector<8x96xf32> to vector<8x16xf32>
    %56 = vector.shape_cast %55 : vector<8x16xf32> to vector<1x8x16xf32>
    %57 = vector.extract_strided_slice %38 {offsets = [0, 80], sizes = [8, 16], strides = [1, 1]} : vector<8x96xf32> to vector<8x16xf32>
    %58 = vector.shape_cast %57 : vector<8x16xf32> to vector<1x8x16xf32>
    %59 = vector.shape_cast %56 : vector<1x8x16xf32> to vector<1x1x8x16xf32>
    %60 = vector.shape_cast %58 : vector<1x8x16xf32> to vector<1x1x8x16xf32>
    %61 = tpu.concatenate %59, %60 in 0 : vector<1x1x8x16xf32>, vector<1x1x8x16xf32> -> vector<2x1x8x16xf32>
    %62 = vector.shape_cast %61 : vector<2x1x8x16xf32> to vector<2x8x16xf32>
    %63 = arith.truncf %46 : vector<2x8x16xf32> to vector<2x8x16xbf16>
    %64 = arith.truncf %54 : vector<2x8x16xf32> to vector<2x8x16xbf16>
    "tpu.trace_start"() <{level = 10 : i32, message = "bqd,bkd->bqk"}> : () -> ()
    %cst_19 = arith.constant dense<0.000000e+00> : vector<2x8x8xf32>
    %65 = tpu.matmul %63, %64, %cst_19 {dimension_numbers = #tpu.dot_dimension_numbers<[2], [2], [1], [1], [0, 0, 0, 1, 1, 1], [0], [0]>} : vector<2x8x16xbf16>, vector<2x8x16xbf16>, vector<2x8x8xf32> -> vector<2x8x8xf32>
    "tpu.trace_stop"() : () -> ()
    %cst_20 = arith.constant 2.500000e-01 : f32
    %66 = vector.broadcast %cst_20 : f32 to vector<2x8x8xf32>
    %67 = arith.mulf %65, %66 : vector<2x8x8xf32>
    %cst_21 = arith.constant dense<0xFF800000> : vector<2x8xf32>
    %68 = vector.multi_reduction <maximumf>, %67, %cst_21 [2] : vector<2x8x8xf32> to vector<2x8xf32>
    %69 = vector.shape_cast %68 : vector<2x8xf32> to vector<2x8x1xf32>
    %70 = vector.broadcast %69 : vector<2x8x1xf32> to vector<2x8x8xf32>
    %71 = arith.subf %67, %70 : vector<2x8x8xf32>
    %72 = math.exp %71 : vector<2x8x8xf32>
    %cst_22 = arith.constant dense<0.000000e+00> : vector<2x8xf32>
    %73 = vector.multi_reduction <add>, %72, %cst_22 [2] : vector<2x8x8xf32> to vector<2x8xf32>
    %74 = vector.shape_cast %73 : vector<2x8xf32> to vector<2x8x1xf32>
    %75 = tpu.reciprocal %74 {approx = true} : vector<2x8x1xf32> -> vector<2x8x1xf32>
    %76 = vector.broadcast %75 : vector<2x8x1xf32> to vector<2x8x8xf32>
    %77 = arith.mulf %72, %76 : vector<2x8x8xf32>
    %c1_i32 = arith.constant 1 : i32
    %78 = arith.cmpi eq, %arg1, %c1_i32 : i32
    %79 = arith.extui %78 : i1 to i32
    %c0_i32_23 = arith.constant 0 : i32
    %80 = arith.cmpi ne, %79, %c0_i32_23 : i32
    scf.if %80 {
      %155 = vector.shape_cast %77 : vector<2x8x8xf32> to vector<2x1x8x8xf32>
      %c0_65 = arith.constant 0 : index
      %c0_66 = arith.constant 0 : index
      %c0_67 = arith.constant 0 : index
      %c0_68 = arith.constant 0 : index
      %156 = vector.load %arg16[%c0_65, %c0_66, %c0_67, %c0_68] : memref<2x1x8x8xf32, #tpu.memory_space<vmem>>, vector<2x1x8x8xf32>
      tpu.vector_store %arg16[%c0_65, %c0_66, %c0_67, %c0_68], %155 {strides = array<i32>} : memref<2x1x8x8xf32, #tpu.memory_space<vmem>>, vector<2x1x8x8xf32>,
    } else {
    }
    %81 = arith.truncf %77 : vector<2x8x8xf32> to vector<2x8x8xbf16>
    %82 = arith.truncf %62 : vector<2x8x16xf32> to vector<2x8x16xbf16>
    "tpu.trace_start"() <{level = 10 : i32, message = "bqk,bkd->bqd"}> : () -> ()
    %cst_24 = arith.constant dense<0.000000e+00> : vector<2x8x16xf32>
    %83 = tpu.matmul %81, %82, %cst_24 {dimension_numbers = #tpu.dot_dimension_numbers<[2], [1], [1], [2], [0, 0, 0, 1, 1, 2], [0], [0]>} : vector<2x8x8xbf16>, vector<2x8x16xbf16>, vector<2x8x16xf32> -> vector<2x8x16xf32>
    "tpu.trace_stop"() : () -> ()
    %84 = vector.extract_strided_slice %83 {offsets = [0, 0, 0], sizes = [1, 8, 16], strides = [1, 1, 1]} : vector<2x8x16xf32> to vector<1x8x16xf32>
    %85 = vector.shape_cast %84 : vector<1x8x16xf32> to vector<8x16xf32>
    %86 = vector.extract_strided_slice %83 {offsets = [1, 0, 0], sizes = [1, 8, 16], strides = [1, 1, 1]} : vector<2x8x16xf32> to vector<1x8x16xf32>
    %87 = vector.shape_cast %86 : vector<1x8x16xf32> to vector<8x16xf32>
    %88 = tpu.concatenate %85, %87 in 1 : vector<8x16xf32>, vector<8x16xf32> -> vector<8x32xf32>
    %89 = arith.truncf %88 : vector<8x32xf32> to vector<8x32xbf16>
    %c0_25 = arith.constant 0 : index
    %c0_26 = arith.constant 0 : index
    %c0_27 = arith.constant 0 : index
    %90 = vector.load %arg7[%c0_25, %c0_26, %c0_27] : memref<1x32x32xbf16, #tpu.memory_space<vmem>>, vector<1x32x32xbf16>
    %91 = vector.shape_cast %90 : vector<1x32x32xbf16> to vector<32x32xbf16>
    %cst_28 = arith.constant dense<0.000000e+00> : vector<8x32xf32>
    %92 = tpu.matmul %89, %91, %cst_28 {dimension_numbers = #tpu.dot_dimension_numbers<[1], [0], [0], [1], [0, 0, 1, 1], [], []>} : vector<8x32xbf16>, vector<32x32xbf16>, vector<8x32xf32> -> vector<8x32xf32>
    %93 = arith.addf %3, %92 : vector<8x32xf32>
    %c0_29 = arith.constant 0 : index
    %c0_30 = arith.constant 0 : index
    %c0_31 = arith.constant 0 : index
    %94 = vector.load %arg8[%c0_29, %c0_30, %c0_31] : memref<1x1x32xf32, #tpu.memory_space<vmem>>, vector<1x1x32xf32>
    %95 = vector.shape_cast %94 : vector<1x1x32xf32> to vector<32xf32>
    %96 = vector.shape_cast %95 : vector<32xf32> to vector<1x32xf32>
    %97 = vector.broadcast %96 : vector<1x32xf32> to vector<8x32xf32>
    %98 = arith.addf %93, %97 : vector<8x32xf32>
    %c0_32 = arith.constant 0 : index
    %c0_33 = arith.constant 0 : index
    %c0_34 = arith.constant 0 : index
    %99 = vector.load %arg9[%c0_32, %c0_33, %c0_34] : memref<1x1x32xf32, #tpu.memory_space<vmem>>, vector<1x1x32xf32>
    %100 = vector.shape_cast %99 : vector<1x1x32xf32> to vector<32xf32>
    %c0_35 = arith.constant 0 : index
    %c0_36 = arith.constant 0 : index
    %c0_37 = arith.constant 0 : index
    %101 = vector.load %arg10[%c0_35, %c0_36, %c0_37] : memref<1x1x32xf32, #tpu.memory_space<vmem>>, vector<1x1x32xf32>
    %102 = vector.shape_cast %101 : vector<1x1x32xf32> to vector<32xf32>
    %cst_38 = arith.constant dense<0.000000e+00> : vector<8xf32>
    %103 = vector.multi_reduction <add>, %98, %cst_38 [1] : vector<8x32xf32> to vector<8xf32>
    %104 = vector.shape_cast %103 : vector<8xf32> to vector<8x1xf32>
    %cst_39 = arith.constant 3.200000e+01 : f32
    %105 = vector.broadcast %cst_39 : f32 to vector<8x1xf32>
    %106 = arith.divf %104, %105 : vector<8x1xf32>
    %107 = vector.broadcast %106 : vector<8x1xf32> to vector<8x32xf32>
    %108 = arith.subf %98, %107 : vector<8x32xf32>
    %109 = arith.mulf %108, %108 : vector<8x32xf32>
    %cst_40 = arith.constant dense<0.000000e+00> : vector<8xf32>
    %110 = vector.multi_reduction <add>, %109, %cst_40 [1] : vector<8x32xf32> to vector<8xf32>
    %111 = vector.shape_cast %110 : vector<8xf32> to vector<8x1xf32>
    %cst_41 = arith.constant 3.200000e+01 : f32
    %112 = vector.broadcast %cst_41 : f32 to vector<8x1xf32>
    %113 = arith.divf %111, %112 : vector<8x1xf32>
    %cst_42 = arith.constant 9.99999974E-6 : f32
    %114 = vector.broadcast %cst_42 : f32 to vector<8x1xf32>
    %115 = arith.addf %113, %114 : vector<8x1xf32>
    %116 = math.rsqrt %115 : vector<8x1xf32>
    %117 = vector.broadcast %116 : vector<8x1xf32> to vector<8x32xf32>
    %118 = arith.mulf %108, %117 : vector<8x32xf32>
    %119 = vector.shape_cast %100 : vector<32xf32> to vector<1x32xf32>
    %120 = vector.broadcast %119 : vector<1x32xf32> to vector<8x32xf32>
    %121 = arith.mulf %118, %120 : vector<8x32xf32>
    %122 = vector.shape_cast %102 : vector<32xf32> to vector<1x32xf32>
    %123 = vector.broadcast %122 : vector<1x32xf32> to vector<8x32xf32>
    %124 = arith.addf %121, %123 : vector<8x32xf32>
    %125 = arith.truncf %124 : vector<8x32xf32> to vector<8x32xbf16>
    %c0_43 = arith.constant 0 : index
    %c0_44 = arith.constant 0 : index
    %c0_45 = arith.constant 0 : index
    %126 = vector.load %arg11[%c0_43, %c0_44, %c0_45] : memref<1x32x64xbf16, #tpu.memory_space<vmem>>, vector<1x32x64xbf16>
    %127 = vector.shape_cast %126 : vector<1x32x64xbf16> to vector<32x64xbf16>
    %cst_46 = arith.constant dense<0.000000e+00> : vector<8x64xf32>
    %128 = tpu.matmul %125, %127, %cst_46 {dimension_numbers = #tpu.dot_dimension_numbers<[1], [0], [0], [1], [0, 0, 1, 1], [], []>} : vector<8x32xbf16>, vector<32x64xbf16>, vector<8x64xf32> -> vector<8x64xf32>
    %c0_47 = arith.constant 0 : index
    %c0_48 = arith.constant 0 : index
    %c0_49 = arith.constant 0 : index
    %129 = vector.load %arg12[%c0_47, %c0_48, %c0_49] : memref<1x1x64xf32, #tpu.memory_space<vmem>>, vector<1x1x64xf32>
    %130 = vector.shape_cast %129 : vector<1x1x64xf32> to vector<64xf32>
    %131 = vector.shape_cast %130 : vector<64xf32> to vector<1x64xf32>
    %132 = vector.broadcast %131 : vector<1x64xf32> to vector<8x64xf32>
    %133 = arith.addf %128, %132 : vector<8x64xf32>
    %cst_50 = arith.constant 5.000000e-01 : f32
    %134 = vector.broadcast %cst_50 : f32 to vector<8x64xf32>
    %135 = arith.mulf %134, %133 : vector<8x64xf32>
    %cst_51 = arith.constant 0.707106769 : f32
    %136 = vector.broadcast %cst_51 : f32 to vector<8x64xf32>
    %137 = arith.mulf %133, %136 : vector<8x64xf32>
    %138 = math.erf %137 : vector<8x64xf32>
    %cst_52 = arith.constant 1.000000e+00 : f32
    %139 = vector.broadcast %cst_52 : f32 to vector<8x64xf32>
    %140 = arith.addf %139, %138 : vector<8x64xf32>
    %141 = arith.mulf %135, %140 : vector<8x64xf32>
    %142 = arith.truncf %141 : vector<8x64xf32> to vector<8x64xbf16>
    %c0_53 = arith.constant 0 : index
    %c0_54 = arith.constant 0 : index
    %c0_55 = arith.constant 0 : index
    %143 = vector.load %arg13[%c0_53, %c0_54, %c0_55] : memref<1x64x32xbf16, #tpu.memory_space<vmem>>, vector<1x64x32xbf16>
    %144 = vector.shape_cast %143 : vector<1x64x32xbf16> to vector<64x32xbf16>
    %cst_56 = arith.constant dense<0.000000e+00> : vector<8x32xf32>
    %145 = tpu.matmul %142, %144, %cst_56 {dimension_numbers = #tpu.dot_dimension_numbers<[1], [0], [0], [1], [0, 0, 1, 1], [], []>} : vector<8x64xbf16>, vector<64x32xbf16>, vector<8x32xf32> -> vector<8x32xf32>
    %146 = arith.addf %98, %145 : vector<8x32xf32>
    %c0_57 = arith.constant 0 : index
    %c0_58 = arith.constant 0 : index
    %c0_59 = arith.constant 0 : index
    %147 = vector.load %arg14[%c0_57, %c0_58, %c0_59] : memref<1x1x32xf32, #tpu.memory_space<vmem>>, vector<1x1x32xf32>
    %148 = vector.shape_cast %147 : vector<1x1x32xf32> to vector<32xf32>
    %149 = vector.shape_cast %148 : vector<32xf32> to vector<1x32xf32>
    %150 = vector.broadcast %149 : vector<1x32xf32> to vector<8x32xf32>
    %151 = arith.addf %146, %150 : vector<8x32xf32>
    %c0_60 = arith.constant 0 : index
    %c0_61 = arith.constant 0 : index
    %152 = vector.load %arg17[%c0_60, %c0_61] : memref<8x32xf32, #tpu.memory_space<vmem>>, vector<8x32xf32>
    tpu.vector_store %arg17[%c0_60, %c0_61], %151 {strides = array<i32>} : memref<8x32xf32, #tpu.memory_space<vmem>>, vector<8x32xf32>,
    %153 = vector.shape_cast %151 : vector<8x32xf32> to vector<1x8x32xf32>
    %c0_62 = arith.constant 0 : index
    %c0_63 = arith.constant 0 : index
    %c0_64 = arith.constant 0 : index
    %154 = vector.load %arg15[%c0_62, %c0_63, %c0_64] : memref<1x8x32xf32, #tpu.memory_space<vmem>>, vector<1x8x32xf32>
    tpu.vector_store %arg15[%c0_62, %c0_63, %c0_64], %153 {strides = array<i32>} : memref<1x8x32xf32, #tpu.memory_space<vmem>>, vector<1x8x32xf32>,
    return
  }
  func.func @transform_0(%arg0: i32, %arg1: i32) -> (i32, i32, i32) {
    %c0_i32 = arith.constant 0 : i32
    %c0_i32_0 = arith.constant 0 : i32
    %c0_i32_1 = arith.constant 0 : i32
    return %arg0, %c0_i32, %c0_i32_0 : i32, i32, i32
  }
  func.func @transform_1(%arg0: i32, %arg1: i32) -> (i32, i32, i32) {
    %c0_i32 = arith.constant 0 : i32
    %c0_i32_0 = arith.constant 0 : i32
    %c0_i32_1 = arith.constant 0 : i32
    return %arg1, %c0_i32, %c0_i32_0 : i32, i32, i32
  }
  func.func @transform_2(%arg0: i32, %arg1: i32) -> (i32, i32, i32) {
    %c0_i32 = arith.constant 0 : i32
    %c0_i32_0 = arith.constant 0 : i32
    %c0_i32_1 = arith.constant 0 : i32
    return %arg1, %c0_i32, %c0_i32_0 : i32, i32, i32
  }
  func.func @transform_3(%arg0: i32, %arg1: i32) -> (i32, i32, i32) {
    %c0_i32 = arith.constant 0 : i32
    %c0_i32_0 = arith.constant 0 : i32
    %c0_i32_1 = arith.constant 0 : i32
    return %arg1, %c0_i32, %c0_i32_0 : i32, i32, i32
  }
  func.func @transform_4(%arg0: i32, %arg1: i32) -> (i32, i32, i32) {
    %c0_i32 = arith.constant 0 : i32
    %c0_i32_0 = arith.constant 0 : i32
    %c0_i32_1 = arith.constant 0 : i32
    return %arg1, %c0_i32, %c0_i32_0 : i32, i32, i32
  }
  func.func @transform_5(%arg0: i32, %arg1: i32) -> (i32, i32, i32) {
    %c0_i32 = arith.constant 0 : i32
    %c0_i32_0 = arith.constant 0 : i32
    %c0_i32_1 = arith.constant 0 : i32
    return %arg1, %c0_i32, %c0_i32_0 : i32, i32, i32
  }
  func.func @transform_6(%arg0: i32, %arg1: i32) -> (i32, i32, i32) {
    %c0_i32 = arith.constant 0 : i32
    %c0_i32_0 = arith.constant 0 : i32
    %c0_i32_1 = arith.constant 0 : i32
    return %arg1, %c0_i32, %c0_i32_0 : i32, i32, i32
  }
  func.func @transform_7(%arg0: i32, %arg1: i32) -> (i32, i32, i32) {
    %c0_i32 = arith.constant 0 : i32
    %c0_i32_0 = arith.constant 0 : i32
    %c0_i32_1 = arith.constant 0 : i32
    return %arg1, %c0_i32, %c0_i32_0 : i32, i32, i32
  }
  func.func @transform_8(%arg0: i32, %arg1: i32) -> (i32, i32, i32) {
    %c0_i32 = arith.constant 0 : i32
    %c0_i32_0 = arith.constant 0 : i32
    %c0_i32_1 = arith.constant 0 : i32
    return %arg1, %c0_i32, %c0_i32_0 : i32, i32, i32
  }
  func.func @transform_9(%arg0: i32, %arg1: i32) -> (i32, i32, i32) {
    %c0_i32 = arith.constant 0 : i32
    %c0_i32_0 = arith.constant 0 : i32
    %c0_i32_1 = arith.constant 0 : i32
    return %arg1, %c0_i32, %c0_i32_0 : i32, i32, i32
  }
  func.func @transform_10(%arg0: i32, %arg1: i32) -> (i32, i32, i32) {
    %c0_i32 = arith.constant 0 : i32
    %c0_i32_0 = arith.constant 0 : i32
    %c0_i32_1 = arith.constant 0 : i32
    return %arg1, %c0_i32, %c0_i32_0 : i32, i32, i32
  }
  func.func @transform_11(%arg0: i32, %arg1: i32) -> (i32, i32, i32) {
    %c0_i32 = arith.constant 0 : i32
    %c0_i32_0 = arith.constant 0 : i32
    %c0_i32_1 = arith.constant 0 : i32
    return %arg1, %c0_i32, %c0_i32_0 : i32, i32, i32
  }
  func.func @transform_12(%arg0: i32, %arg1: i32) -> (i32, i32, i32) {
    %c0_i32 = arith.constant 0 : i32
    %c0_i32_0 = arith.constant 0 : i32
    %c0_i32_1 = arith.constant 0 : i32
    return %arg1, %c0_i32, %c0_i32_0 : i32, i32, i32
  }
  func.func @transform_13(%arg0: i32, %arg1: i32) -> (i32, i32, i32) {
    %c0_i32 = arith.constant 0 : i32
    %c0_i32_0 = arith.constant 0 : i32
    %c0_i32_1 = arith.constant 0 : i32
    return %arg0, %c0_i32, %c0_i32_0 : i32, i32, i32
  }
  func.func @transform_14(%arg0: i32, %arg1: i32) -> (i32, i32, i32, i32) {
    %c0_i32 = arith.constant 0 : i32
    %c0_i32_0 = arith.constant 0 : i32
    %c0_i32_1 = arith.constant 0 : i32
    %c0_i32_2 = arith.constant 0 : i32
    return %c0_i32, %arg0, %c0_i32_0, %c0_i32_1 : i32, i32, i32, i32
  }
}

</mosaic_0001>

<bundles_post_ra>
// kernel: transformer_forward.1
= control target key start
LH: loop header
LB: loop body
LE: loop exit
PB: predicated region body
PF: predicated region fallthrough
CT: control target
= control target key end

     0   :  { %s2689_s0 = inlined_call_operand.hbm [shape: f32[2,8,32], index: 0, kind: input, shape index: {}]   ;;  %s2690_s1 = inlined_call_operand.vmem [shape: f32[2,1,32], index: 1, kind: input, shape index: {}]   ;;  %s2691_s2 = inlined_call_operand.hbm [shape: f32[2,1,32], index: 2, kind: input, shape index: {}]   ;;  %s2692_s3 = inlined_call_operand.vmem [shape: bf16[2,32,96], index: 3, kind: input, shape index: {}]   ;;  %s2693_s4 = inlined_call_operand.hbm [shape: f32[2,1,96], index: 4, kind: input, shape index: {}]   ;;  %s2694_s5 = inlined_call_operand.vmem [shape: bf16[2,32,32], index: 5, kind: input, shape index: {}]   ;;  %s2695_s6 = inlined_call_operand.hbm [shape: f32[2,1,32], index: 6, kind: input, shape index: {}]   ;;  %s2696_s7 = inlined_call_operand.vmem [shape: f32[2,1,32], index: 7, kind: input, shape index: {}]   ;;  %s2697_s8 = inlined_call_operand.hbm [shape: f32[2,1,32], index: 8, kind: input, shape index: {}]   ;;  %s2698_s9 = inlined_call_operand.vmem [shape: bf16[2,32,64], index: 9, kind: input, shape index: {}]   ;;  %s2699_s10 = inlined_call_operand.hbm [shape: f32[2,1,64], index: 10, kind: input, shape index: {}]   ;;  %s2700_s11 = inlined_call_operand.vmem [shape: bf16[2,64,32], index: 11, kind: input, shape index: {}]   ;;  %s2701_s12 = inlined_call_operand.hbm [shape: f32[2,1,32], index: 12, kind: input, shape index: {}]   ;;  %s2702_s13 = inlined_call_operand.hbm [shape: f32[2,8,32], index: 13, kind: output, shape index: {0}]   ;;  %s2703_s14 = inlined_call_operand.vmem [shape: f32[2,2,8,8], index: 14, kind: output, shape index: {1}]  }
   0x1   :  { %2718 = sst [smem:[#allocation33_spill]] %s2689_s0 }
   0x2   :  { %2719 = sst [smem:[#allocation34_spill]] %s2690_s1 }
   0x3   :  { %2720 = sst [smem:[#allocation35_spill]] %s2691_s2 }
   0x4   :  { %2721 = sst [smem:[#allocation36_spill]] %s2692_s3 }
   0x5   :  { %2722 = sst [smem:[#allocation37_spill]] %s2693_s4 }
   0x6   :  { %2723 = sst [smem:[#allocation38_spill]] %s2694_s5 }
   0x7   :  { %2724 = sst [smem:[#allocation39_spill]] %s2695_s6 }
   0x8   :  { %2725 = sst [smem:[#allocation40_spill]] %s2696_s7 }
   0x9   :  { %2726 = sst [smem:[#allocation41_spill]] %s2697_s8 }
   0xa   :  { %2727 = sst [smem:[#allocation42_spill]] %s2698_s9 }
   0xb   :  { %2728 = sst [smem:[#allocation43_spill]] %s2699_s10 }
   0xc   :  { %2729 = sst [smem:[#allocation44_spill]] %s2700_s11 }
   0xd   :  { %2730 = sst [smem:[#allocation45_spill]] %s2701_s12 }
   0xe   :  { %2731 = sst [smem:[#allocation46_spill]] %s2702_s13 }
   0xf   :  { %2732 = sst [smem:[#allocation47_spill]] %s2703_s14 }
  0x10   :  { %20 = vsyncpa [#allocation4], 0 }
  0x11   :  { %22 = vsyncpa [#allocation4 + $0x1], 0 }
  0x12   :  { %23 = vsyncpa [#allocation7], 0 }
  0x13   :  { %25 = vsyncpa [#allocation7 + $0x1], 0 }
  0x14   :  { %26 = vsyncpa [#allocation10], 0 }
  0x15   :  { %28 = vsyncpa [#allocation10 + $0x1], 0 }
  0x16   :  { %29 = vsyncpa [#allocation13], 0 }
  0x17   :  { %31 = vsyncpa [#allocation13 + $0x1], 0 }
  0x18   :  { %32 = vsyncpa [#allocation5], 0 }
  0x19   :  { %34 = vsyncpa [#allocation5 + $0x1], 0  ;;  %s2263_s29 = smov 0   ;;  %s2265_s30 = smov 0  }
  0x1a   :  { %s2267_s15 = smov 0   ;;  %s2269_s16 = smov 0  }
  0x1b   :  { %s2271_s17 = smov 0   ;;  %s2273_s18 = smov 0  }
  0x1c   :  { %s2275_s19 = smov 0   ;;  %s2277_s20 = smov 0  }
  0x1d   :  { %s2279_s21 = smov 0   ;;  %s2281_s22 = smov 0  }
  0x1e   :  { %s2283_s23 = smov 0  }
  0x1f LB: > { %2733 = sst [smem:[#allocation22_spill]] %s2149_s15  ;;  %p67_p0 = scmp.eq.s32.totalorder %s2181_s23, 0  ;;  %s2181_s23 = sphi %s2283_s23, %s40_s23   ;;  %s2177_s22 = sphi %s2281_s22, %s2791_s22   ;;  %s2173_s21 = sphi %s2279_s21, %s2790_s21   ;;  %s2169_s20 = sphi %s2277_s20, %s2789_s20   ;;  %s2165_s19 = sphi %s2275_s19, %s2788_s19   ;;  %s2161_s18 = sphi %s2273_s18, %s2787_s18   ;;  %s2157_s17 = sphi %s2271_s17, %s2795_s17   ;;  %s2153_s16 = sphi %s2269_s16, %s2794_s16   ;;  %s2149_s15 = sphi %s2267_s15, %s2785_s15   ;;  %s2145_s30 = sphi %s2265_s30, %s2793_s30   ;;  %s2141_s29 = sphi %s2263_s29, %s2792_s29  }
  0x20   : > { %2734 = sst [smem:[#allocation23_spill]] %s2153_s16  ;;  %p118_p1 = scmp.ne.s32.totalorder %s2149_s15, %s2145_s30 }
  0x21   : > { %2735 = sst [smem:[#allocation24_spill]] %s2161_s18  ;;  %p2709_p2 = scmp.lt.s32.totalorder %s2181_s23, 4 }
  0x22   : > { %2736 = sst [smem:[#allocation25_spill]] %s2169_s20  ;;  %s2324_s25 = sand.u32 1, %s2181_s23  }
  0x23   : > { %2737 = sst [smem:[#allocation26_spill]] %s2173_s21  ;;  %p120_p3 = por %p118_p1, %p67_p0 }
  0x24   : > { %2738 = sst [smem:[#allocation27_spill]] %s2177_s22  ;;  %s2329_s26 = sand.u32 1, %s2149_s15  }
  0x25   : > { %s2739_s2 = sld [smem:[#allocation35_spill]]  ;;  %s488_s24 = scalar_lea.vmem [#allocation6], %s2329_s26 }
  0x26   : > { %s495_s20 = sshll.u32 %s488_s24, 4  ;;  %p2338_p4 = pnand %p2709_p2, %p120_p3  ;;  %s496_s20 = int_to_ptr.vmem [resolvable:$true] %s495_s20 }
  0x27   : > { %p1593_p5 = scmp.ge.s32.totalorder %s2181_s23, 1  ;;  %p623_p6 = scmp.lt.s32.totalorder %s2181_s23, 5 }
  0x28   : > { %s2705_s27 = scalar_lea.sflag [#allocation7], %s2324_s25  ;;  %s2742_s6 = sld [smem:[#allocation39_spill]] }
  0x29   : > { %p2349_p7 = pnand %p1593_p5, %p623_p6  ;;  %s538_s9 = scalar_lea.vmem [#allocation9], %s2329_s26 }
  0x2a   : > { %s545_s7 = sshll.u32 %s538_s9, 4  ;;  %s2743_s10 = sld [smem:[#allocation43_spill]]  ;;  %s546_s7 = int_to_ptr.vmem [resolvable:$true] %s545_s7 }
  0x2b   : > { %s491_s14 = scalar_lea.hbm %s2739_s2, %s2173_s21  ;;  %s586_s9 = scalar_lea.vmem [#allocation12], %s2329_s26 }
  0x2c   : > { %s493_s13 = sshll.u32 %s491_s14, 4  ;;  %s52_s24 = sadd.s32 1, %s2177_s22  ;;  %s494_s13 = int_to_ptr.hbm [resolvable:$true] %s493_s13 }
  0x2d   : > { %1698 = dma.hbm_to_vmem [thread:$0]  (!%p2338_p4), %s494_s13, 16, %s496_s20, %s2705_s27  }
  0x2e   : > { %s541_s2 = scalar_lea.hbm %s2742_s6, %s2173_s21  ;;  %s2707_s13 = scalar_lea.sflag [#allocation10], %s2324_s25 }
  0x2f   : > { %s543_s5 = sshll.u32 %s541_s2, 4  ;;  %s593_s2 = sshll.u32 %s586_s9, 4  ;;  %s544_s5 = int_to_ptr.hbm [resolvable:$true] %s543_s5  ;;  %s594_s2 = int_to_ptr.vmem [resolvable:$true] %s593_s2 }
  0x30   : > { %1704 = dma.hbm_to_vmem [thread:$0]  (!%p2338_p4), %s544_s5, 16, %s546_s7, %s2707_s13  }
  0x31   : > { %s589_s28 = scalar_lea.hbm %s2743_s10, %s2173_s21  ;;  %s2706_s6 = scalar_lea.sflag [#allocation13], %s2324_s25 }
  0x32   : > { %s591_s27 = sshll.u32 %s589_s28, 4  ;;  %s2374_s5 = sadd.s32 4294967295, %s2181_s23   ;;  %s592_s27 = int_to_ptr.hbm [resolvable:$true] %s591_s27 }
  0x33   : > { %1710 = dma.hbm_to_vmem [thread:$0]  (!%p2338_p4), %s592_s27, 16, %s594_s2, %s2706_s6  }
  0x34   : > { %s1588_s7 = sadd.s32 4294967294, %s2181_s23   ;;  %s49_s20 = sadd.s32 1, %s2173_s21 }
  0x35   : > { %p50_p8 = scmp.ge.s32.totalorder %s49_s20, 2  ;;  %s59_s28 = sadd.s32 1, %s2161_s18 }
  0x36   : > { %p66_p9 = scmp.ne.s32.totalorder %s2161_s18, %s2157_s17  ;;  %p72_p10 = scmp.ne.s32.totalorder %s2157_s17, %s2153_s16 }
  0x37   : > { %s2797_s20 = smov (%p50_p8, %s49_s20), 0  ;;  %s2799_s24 = smov (!%p50_p8, %s52_s24), %s2177_s22 }
  0x38   : > { %2744 = sst [smem:[#allocation28_spill]] %s2797_s20  ;;  %p2392_p11 = por %p67_p0, %p66_p9 }
  0x39   : > { %p73_p12 = scmp.eq.s32.totalorder %s2374_s5, 0  ;;  %p54_p13 = scmp.ge.s32.totalorder %s2799_s24, 2 }
  0x3a   : > { %s108_s9 = ssub.s32 %s2173_s21, %s2797_s20  ;;  %s2748_s6 = sadd.s32 1, %s2149_s15 }
  0x3b   : > { %p2402_p1 = por %p73_p12, %p72_p10  ;;  %p109_p3 = scmp.eq.s32.totalorder %s108_s9, 0 }
  0x3c   : > { %s2801_s24 = smov (%p54_p13, %s2799_s24), 0  ;;  %p124_p0 = scmp.ne.s32.totalorder %s2145_s30, %s2141_s29 }
  0x3d   : > { %2747 = sst [smem:[#allocation29_spill]] %s2801_s24  ;;  %s56_s10 = ssub.s32 %s2177_s22, %s2801_s24 }
  0x3e   : > { %s2411_s13 = scalar_select %p109_p3, %s2149_s15, %s2748_s6  }
  0x3f   : > { %p57_p5 = scmp.eq.s32.totalorder %s56_s10, 0  ;;  %p408_p6 = scmp.eq.s32.totalorder %s2374_s5, 3 }
  0x40   : > { %2749 = sst [smem:[#allocation30_spill]] %s2411_s13  ;;  %p2418_p8 = por %p124_p0, %p73_p12 }
  0x41   : > { %p414_p2 = scmp.eq.s32.totalorder %s1588_s7, 3  ;;  %p2428_p13 = por %p408_p6, %p66_p9 }
  0x42   : > { %s2423_s9 = scalar_select %p57_p5, %s2161_s18, %s59_s28  }
  0x43   : > { %p2435_p3 = por %p414_p2, %p72_p10  ;;  %s460_s10 = sand.u32 1, %s2161_s18  }
  0x44   : > { %2751 = sst [smem:[#allocation31_spill]] %s2423_s9  ;;  %s1592_s29 = sshll.u32 %s2177_s22, 3 }
  0x45   : > { %s2753_s6 = scalar_select %p2435_p3, 1, 0 }
  0x46   : > { %s1591_s24 = sshll.u32 %s460_s10, 3  ;;  %s2755_s0 = sld [smem:[#allocation33_spill]] }
  0x47   : > { %2754 = sst [smem:[#allocation32_spill]] %s2753_s6  ;;  %s464_s9 = scalar_lea.vmem [#allocation3], %s1591_s24 }
  0x48   : > { %s472_s1 = sshll.u32 %s464_s9, 4  ;;  %p2756_p2 = scmp.lt.s32.totalorder %s2181_s23, 4  ;;  %s473_s1 = int_to_ptr.vmem [resolvable:$true] %s472_s1 }
  0x49   : > { %s2757_s4 = sld [smem:[#allocation37_spill]]  ;;  %s513_s15 = scalar_lea.vmem [#allocation8], %s2329_s26 }
  0x4a   : > { %p1693_p9 = pnand %p2756_p2, %p2392_p11  ;;  %s520_s13 = sshll.u32 %s513_s15, 4  ;;  %s521_s13 = int_to_ptr.vmem [resolvable:$true] %s520_s13 }
  0x4b   : > { %s2758_s24 = scalar_lea.sflag [#allocation7], %s2324_s25  ;;  %s2759_s8 = sld [smem:[#allocation41_spill]] }
  0x4c   : > { %s468_s7 = scalar_lea.hbm %s2755_s0, %s1592_s29  ;;  %s561_s0 = scalar_lea.vmem [#allocation11], %s2329_s26 }
  0x4d   : > { %s470_s28 = sshll.u32 %s468_s7, 4  ;;  %s461_s7 = scalar_lea.sflag [#allocation4], %s460_s10  ;;  %s471_s28 = int_to_ptr.hbm [resolvable:$true] %s470_s28 }
  0x4e   : > { %1695 = dma.hbm_to_vmem [thread:$0]  (!%p1693_p9), %s471_s28, 128, %s473_s1, %s461_s7  }
  0x4f   : > { %s516_s22 = scalar_lea.hbm %s2757_s4, %s2173_s21  ;;  %s568_s4 = sshll.u32 %s561_s0, 4  ;;  %s569_s4 = int_to_ptr.vmem [resolvable:$true] %s568_s4 }
  0x50   : > { %s518_s29 = sshll.u32 %s516_s22, 4  ;;  %s2760_s22 = scalar_lea.sflag [#allocation10], %s2324_s25  ;;  %s519_s29 = int_to_ptr.hbm [resolvable:$true] %s518_s29 }
  0x51   : > { %1701 = dma.hbm_to_vmem [thread:$0]  (!%p2338_p4), %s519_s29, 16, %s521_s13, %s2758_s24  }
  0x52   : > { %s564_s18 = scalar_lea.hbm %s2759_s8, %s2173_s21  ;;  %s2761_s12 = sld [smem:[#allocation45_spill]] }
  0x53   : > { %s566_s6 = sshll.u32 %s564_s18, 4  ;;  %s611_s7 = scalar_lea.vmem [#allocation14], %s2329_s26  ;;  %s567_s6 = int_to_ptr.hbm [resolvable:$true] %s566_s6 }
  0x54   : > { %1707 = dma.hbm_to_vmem [thread:$0]  (!%p2338_p4), %s567_s6, 16, %s569_s4, %s2760_s22  }
  0x55   : > { %s618_s16 = sshll.u32 %s611_s7, 4  ;;  %s2762_s13 = scalar_lea.sflag [#allocation13], %s2324_s25  ;;  %s619_s16 = int_to_ptr.vmem [resolvable:$true] %s618_s16 }
  0x56   : > { %627 = sbr.rel (%p2349_p7) target bundleno = 2270 (0x8de), region = 72  ;;  %s2478_s0 = sand.u32 (!%p2349_p7), 1, %s2157_s17  }
  0x57   : > { %s2716_s4 = sshll.u32 (!%p2349_p7), %s2478_s0, 3  ;;  %s630_s29 = scalar_lea.sflag (!%p2349_p7), [#allocation4], %s2478_s0 }
  0x58   : > { %s614_s28 = scalar_lea.hbm %s2761_s12, %s2173_s21  ;;  %s2484_s26 = scalar_lea.vmem (!%p2349_p7), [#allocation3], %s2716_s4 }
  0x59   : > { %s616_s15 = sshll.u32 %s614_s28, 4  ;;  %s617_s15 = int_to_ptr.hbm [resolvable:$true] %s616_s15 }
  0x5a   : > { %1713 = dma.hbm_to_vmem [thread:$0]  (!%p2338_p4), %s617_s15, 16, %s619_s16, %s2762_s13  }
  0x5b   : > { %2120 = dma.done.wait (%p2402_p1), %s630_s29, 128  }
  0x5c   : > { %2122 = vsyncadd (%p2402_p1), %s630_s29, 4294967168  ;;  %s639_s11 = sand.u32 1, %s2374_s5   ;;  %s2492_s16 = sand.u32 1, %s2145_s30  }
  0x5d   : > { %s640_s25 = scalar_lea.sflag [#allocation7], %s639_s11 }
  0x5e   : > { %2124 = dma.done.wait (%p2418_p8), %s640_s25, 32  }
  0x5f   : > { %2126 = vsyncadd (%p2418_p8), %s640_s25, 4294967264  ;;  %s658_s2 = scalar_lea.sflag [#allocation10], %s639_s11 }
  0x60   : > { %2128 = dma.done.wait (%p2418_p8), %s658_s2, 32  }
  0x61   : > { %2130 = vsyncadd (%p2418_p8), %s658_s2, 4294967264  ;;  %s676_s9 = scalar_lea.sflag [#allocation13], %s639_s11 }
  0x62   : > { %2132 = dma.done.wait (%p2418_p8), %s676_s9, 32  }
  0x63   : > { %2134 = vsyncadd (%p2418_p8), %s676_s9, 4294967264  ;;  %s1596_s6 = sshll.u32 %s2478_s0, 4  ;;  %p787_p4 = scmp.lt.s32.totalorder %s2165_s19, 1 }
  0x64   : > { %s2764_s29 = sld [smem:[#allocation36_spill]]  ;;  %s2769_s21 = sshll.u32 %s2478_s0, 3 }
  0x65   : > { %s2514_s22 = scalar_select %p787_p4, %s2165_s19, 1 }
  0x66   : > { %s2765_s9 = sld [smem:[#allocation38_spill]]  ;;  %s2549_s25 = scalar_lea.vmem [#allocation15], %s2769_s21 }
  0x67   : > { %s1662_s7 = sshll.u32 %s2514_s22, 4  ;;  %s2766_s24 = sld [smem:[#allocation40_spill]] }
  0x68   : > { %s2767_s4 = sld [smem:[#allocation42_spill]]  ;;  %s1665_s28 = sshll.u32 %s2514_s22, 5 }
  0x69   : > { %s2768_s20 = sld [smem:[#allocation44_spill]]  ;;  %s2551_s2 = scalar_lea.vmem [#allocation16], %s1596_s6 }
  0x6a   : > { %s2524_s11 = scalar_lea.vmem %s2764_s29, %s1662_s7  ;;  %s687_s29 = scalar_lea.vmem [#allocation14], %s2492_s16 }
  0x6b   : > { %p1605_p7 = scmp.ne.s32.totalorder %s2165_s19, 0 }
  0x6c   : > { %s2529_s18 = scalar_lea.vmem %s2765_s9, %s1662_s7 }
  0x6d   : > { %s802_s14 = scalar_lea.vmem %s2766_s24, %s2514_s22  ;;  %817 = sbr.rel (%p1605_p7) target bundleno = 116 (0x74), region = 104 }
  0x6e   : > { %s2538_s8 = scalar_lea.vmem %s2767_s4, %s1662_s7 }
  0x6f   : > { %s2544_s13 = scalar_lea.vmem %s2768_s20, %s1665_s28 }
  0x72   : > { %v818_v0 = vld [vmem:[%s2484_s26] sm:$0xff]  ;;  %vm819_vm0 = vcmask 261120  }
  0x73   : > { %820 = vst.msk [vmem:[#allocation2] sm:$0xff] %vm819_vm0, %v818_v0 }
  0x74 PF: > { %vm824_vm1 = vcmask 261120   ;;  %v2183_v3 = vmov 32.0   ;;  %v1667_v15 = vld [vmem:[%s2524_s11 + $0x8] sm:$0xff]  ;;  %v1666_v16 = vld [vmem:[%s2524_s11] sm:$0xff]  ;;  %s2770_s4 = sld [smem:[#allocation34_spill]]  ;;  %s2772_s24 = scalar_lea.vmem [#allocation6], %s2492_s16 }
  0x75   : > { %1816 = vrcp.f32 %v2183_v3  ;;  %892 = vmatpush.bf16.msra.mxu0 %v1667_v15  ;;  %v1814_v29 = vld [vmem:[%s2772_s24] ss:$0 sm:$0xff]  ;;  %s2773_s27 = scalar_lea.vmem [#allocation8], %s2492_s16  ;;  %s2184_s5 = smov 112   ;;  %vm910_vm6 = vcmask 130048   ;;  %vm956_vm7 = vcmask 64512  }
  0x76   : > { %v1815_v33 = vld [vmem:[%s2773_s27] ss:$0 sm:$0xff]  ;;  %s2185_s6 = smov 96   ;;  %p1617_p10 = scmp.ne.s32.totalorder %s2165_s19, 1 }
  0x79   : > { %893 = vmatpush.bf16.msra.mxu0 %v1666_v16 }
  0x7a   : > { %v2555_v1 = vld [vmem:[#allocation2] sm:$0xff]  ;;  %s2771_s26 = scalar_lea.vmem %s2770_s4, %s2514_s22 }
  0x7b   : > { %v825_v2 = vsel %vm824_vm1, %v2555_v1, 0.0  ;;  %v1817_v4 = vpop.eup %1816  ;;  %v1813_v26 = vld [vmem:[%s2771_s26] ss:$0 sm:$0xff] }
  0x7c   : > { %826 = vadd.xlane.f32.xlu0 %v825_v2  ;;  %v829_v5 = vmul.f32 32.0, %v1817_v4  ;;  %vm833_vm2 = vweird.f32 %v1817_v4 }
  0x7e   : > { %v830_v6 = vsub.f32 1.0, %v829_v5 }
  0x80   : > { %v831_v7 = vmul.f32 %v1817_v4, %v830_v6 }
  0x82   : > { %v832_v8 = vadd.f32 %v1817_v4, %v831_v7 }
  0x84   : > { %v2559_v9 = vsel %vm833_vm2, %v1817_v4, %v832_v8 }
  0xef   : > { %v827_v10 = vpop.xlane.xlu0 %826 }
  0xf0   : > { %v835_v11 = vmul.f32 %v2559_v9, %v827_v10 }
  0xf2   : > { %v836_v12 = vsub.f32 %v2555_v1, %v835_v11 }
  0xf4   : > { %v837_v13 = vmul.f32 %v836_v12, %v836_v12 }
  0xf6   : > { %v838_v14 = vsel %vm824_vm1, %v837_v13, 0.0 }
  0xf7   : > { %839 = vadd.xlane.f32.xlu0 %v838_v14 }
 0x16a   : > { %v840_v17 = vpop.xlane.xlu0 %839 }
 0x16b   : > { %v841_v18 = vmul.f32 %v840_v17, %v2559_v9 }
 0x16d   : > { %v842_v19 = vadd.f32 1e-05, %v841_v18 }
 0x16f   : > { %1818 = vrsqrt.f32 %v842_v19  ;;  %vm849_vm4 = vweird.f32 %v842_v19 }
 0x175   : > { %v1819_v20 = vpop.eup %1818 }
 0x176   : > { %v844_v21 = vmul.f32 %v1819_v20, %v842_v19  ;;  %vm850_vm3 = vweird.f32 %v1819_v20 }
 0x177   : > { %vm851_vm5 = vmor %vm849_vm4, %vm850_vm3 }
 0x178   : > { %v845_v22 = vmul.f32 %v1819_v20, %v844_v21 }
 0x17a   : > { %v846_v23 = vmul.f32 0.5, %v845_v22 }
 0x17c   : > { %v847_v24 = vsub.f32 1.5, %v846_v23 }
 0x17e   : > { %v848_v25 = vmul.f32 %v1819_v20, %v847_v24 }
 0x180   : > { %v852_v27 = vsel %vm851_vm5, %v1819_v20, %v848_v25 }
 0x181   : > { %v853_v28 = vmul.f32 %v852_v27, %v836_v12 }
 0x183   : > { %v857_v30 = vmul.f32 %v1813_v26, %v853_v28 }
 0x185   : > { %v861_v31 = vadd.f32 %v1814_v29, %v857_v30 }
 0x187   : > { %v862_v32 = vpack.c.bf16 %v861_v31, %v861_v31 }
 0x189   : > { %1614 = vmatmul.msk.bf16.vlgmr.msra.gmra.mxu0 %vm824_vm1, %v862_v32 }
 0x206   : > { %v895_v34 = vpop.f32.mrf.mxu0 }
 0x207   : > { %v896_v35 = vadd.f32 %v1815_v33, %v895_v34 }
 0x209   : > { %v903_v36 = vpack.c.bf16 %v896_v35, %v896_v35  ;;  %900 = vrot.lane.b32.xlu1 %v896_v35, %s2184_s5 }
 0x20b   : > { %v906_v37 = vunpack.c.l.b16 %v903_v36 }
 0x20d   : > { %v907_v38 = vpack.c.b16 %v906_v37, %v906_v37 }
 0x20e   : > { %v897_v39 = vpop.f32.mrf.mxu0 }
 0x20f   : > { %908 = vrot.lane.b32.xlu2 %v907_v38, %s2185_s6 }
 0x269   : > { %v909_v40 = vpop.permute.xlu2 %908 }
 0x26a   : > { %v915_v41 = vsel %vm910_vm6, %v909_v40, 0 }
 0x26b   : > { %924 = vmatpush.bf16.xpose.msra.mxu1 %v915_v41 }
 0x272   : > { %1615 = vmatmul.msk.bf16.vlgmr.msra.gmra.mxu1 %vm910_vm6, %v903_v36 }
 0x27b   : > { %v901_v42 = vpop.permute.xlu1 %900 }
 0x27c   : > { %v904_v43 = vpack.c.bf16 %v901_v42, %v901_v42 }
 0x27e   : > { %v931_v44 = vunpack.c.l.b16 %v904_v43 }
 0x280   : > { %v932_v45 = vpack.c.b16 %v931_v44, %v931_v44 }
 0x282   : > { %933 = vrot.lane.b32.xlu1 %v932_v45, %s2185_s6 }
 0x2ef   : > { %v926_v46 = vpop.f32.mrf.mxu1 }
 0x2f0   : > { %v954_v47 = vmul.f32 0.25, %v926_v46 }
 0x2f2   : > { %v957_v48 = vsel %vm956_vm7, %v954_v47, -inf }
 0x2f3   : > { %958 = vmax.xlane.f32.xlu2 %v957_v48 }
 0x2f4   : > { %v934_v49 = vpop.permute.xlu1 %933 }
 0x2f5   : > { %v939_v50 = vsel %vm910_vm6, %v934_v49, 0 }
 0x2f6   : > { %948 = vmatpush.bf16.xpose.msra.mxu2 %v939_v50 }
 0x2f7   : > { %v928_v51 = vpop.f32.mrf.mxu1 }
 0x2fd   : > { %1616 = vmatmul.msk.bf16.vlgmr.msra.gmra.mxu2 %vm910_vm6, %v904_v43 }
 0x366   : > { %v959_v52 = vpop.xlane.xlu2 %958 }
 0x367   : > { %v963_v53 = vsub.f32 %v954_v47, %v959_v52 }
 0x369   : > { %v965_v54 = vmul.f32 1.442695, %v963_v53 }
 0x36b   : > { %1820 = vpow2.f32 %v965_v54 }
 0x371   : > { %v1821_v55 = vpop.eup %1820 }
 0x372   : > { %v969_v56 = vsel %vm956_vm7, %v1821_v55, 0.0 }
 0x373   : > { %970 = vadd.xlane.f32.xlu1 %v969_v56 }
 0x380   : > { %v950_v57 = vpop.f32.mrf.mxu2 }
 0x381   : > { %v955_v58 = vmul.f32 0.25, %v950_v57 }
 0x383   : > { %v960_v59 = vsel %vm956_vm7, %v955_v58, -inf }
 0x384   : > { %961 = vmax.xlane.f32.xlu0 %v960_v59 }
 0x388   : > { %v952_v60 = vpop.f32.mrf.mxu2 }
 0x3e6   : > { %v971_v61 = vpop.xlane.xlu1 %970 }
 0x3e7   : > { %1822 = vrcp.f32 %v971_v61 }
 0x3ed   : > { %v1823_v62 = vpop.eup %1822 }
 0x3ee   : > { %v977_v63 = vmul.f32 %v1823_v62, %v1821_v55 }
 0x3f7   : > { %v962_v0 = vpop.xlane.xlu0 %961 }
 0x3f8   : > { %v964_v2 = vsub.f32 %v955_v58, %v962_v0 }
 0x3fa   : > { %v967_v3 = vmul.f32 1.442695, %v964_v2 }
 0x3fc   : > { %1824 = vpow2.f32 %v967_v3 }
 0x402   : > { %v1825_v4 = vpop.eup %1824 }
 0x403   : > { %v972_v5 = vsel %vm956_vm7, %v1825_v4, 0.0 }
 0x404   : > { %973 = vadd.xlane.f32.xlu0 %v972_v5 }
 0x477   : > { %v974_v6 = vpop.xlane.xlu0 %973 }
 0x478   : > { %1826 = vrcp.f32 %v974_v6 }
 0x47b   : > { %982 = sbr.rel (%p1617_p10) target bundleno = 1154 (0x482), region = 108 }
 0x47e   : > { %v1827_v7 = vpop.eup %1826 }
 0x47f   : > { %v978_v8 = vmul.f32 %v1827_v7, %v1825_v4 }
 0x480   : > { %983 = vst.msk [vmem:[%s2551_s2] sm:$0xff] %vm956_vm7, %v977_v63 }
 0x481   : > { %984 = vst.msk [vmem:[%s2551_s2 + $0x8] sm:$0xff] %vm956_vm7, %v978_v8 }
 0x482 PF: > { %s2186_s15 = smov 64   ;;  %vm992_vm8 = vcmask 1043456   ;;  %v985_v12 = vpack.c.bf16 %v977_v63, %v977_v63  ;;  %v986_v15 = vpack.c.bf16 %v978_v8, %v978_v8  ;;  %v1669_v16 = vld [vmem:[%s2529_s18 + $0x8] sm:$0xff]  ;;  %s2187_s19 = smov 16   ;;  %v1668_v21 = vld [vmem:[%s2529_s18] sm:$0xff]  ;;  %v1675_v59 = vld [vmem:[%s2544_s13 + $0x18] sm:$0xff] }
 0x483   : > { %987 = vrot.lane.b32.xlu0 %v907_v38, %s2186_s15  ;;  %1061 = vmatpush.bf16.msrb.mxu0 %v1669_v16  ;;  %s2774_s7 = scalar_lea.vmem [#allocation9], %s2492_s16  ;;  %v1671_v36 = vld [vmem:[%s2538_s8 + $0x8] sm:$0xff]  ;;  %v1829_v46 = vld [vmem:[%s802_s14] ss:$0 sm:$0xff]  ;;  %s2776_s9 = scalar_lea.vmem [#allocation11], %s2492_s16  ;;  %v1674_v0 = vld [vmem:[%s2544_s13 + $0x10] sm:$0xff] }
 0x484   : > { %v1828_v25 = vld [vmem:[%s2774_s7] ss:$0 sm:$0xff]  ;;  %1136 = vmatpush.bf16.msrb.mxu1 %v1671_v36  ;;  %s2777_s1 = scalar_lea.vmem [#allocation12], %s2492_s16  ;;  %1228 = vmatpush.bf16.msrb.mxu2 %v1675_v59  ;;  %v1673_v4 = vld [vmem:[%s2544_s13 + $0x8] sm:$0xff]  ;;  %s2778_s14 = sld [smem:[#allocation25_spill]]  ;;  %vm1220_vm0 = vcmask 523264  }
 0x485   : > { %v1830_v48 = vld [vmem:[%s2776_s9] ss:$0 sm:$0xff]  ;;  %s2779_s20 = sld [smem:[#allocation46_spill]]  ;;  %s1262_s21 = sshll.u32 %s2549_s25, 4  ;;  %s1263_s21 = int_to_ptr.vmem [resolvable:$true] %s1262_s21 }
 0x486   : > { %v1831_v52 = vld [vmem:[%s2777_s1] ss:$0 sm:$0xff]  ;;  %s1246_s26 = scalar_lea.sflag [#allocation5], %s2478_s0 }
 0x487   : > { %1062 = vmatpush.bf16.msrb.mxu0 %v1668_v21  ;;  %v1672_v8 = vld [vmem:[%s2544_s13] sm:$0xff] }
 0x488   : > { %1229 = vmatpush.bf16.msrb.mxu2 %v1674_v0 }
 0x48a   : > { %s1658_s22 = sshll.u32 %s2778_s14, 3 }
 0x48b   : > { %1009 = vrot.lane.b32.xlu0 %v932_v45, %s2186_s15  ;;  %s2780_s13 = smov %s2779_s20  ;;  %s1260_s12 = scalar_lea.hbm %s2779_s20, %s1658_s22 }
 0x48c   : > { %1230 = vmatpush.bf16.msrb.mxu2 %v1673_v4  ;;  %s1264_s4 = sshll.u32 %s1260_s12, 4  ;;  %s2067_s5 = scalar_lea.hbm %s2780_s13, 16  ;;  %s1265_s4 = int_to_ptr.hbm [resolvable:$true] %s1264_s4 }
 0x48d   : > { %s2061_s24 = sshra.s32 %s1265_s4, 4  ;;  %s2062_s24 = int_to_ptr.hbm [resolvable:$true] %s2061_s24 }
 0x48e   : > { %s2063_s27 = scalar_lea.hbm %s2062_s24, 8  ;;  %p2068_p0 = scmp.lt.s32.totalorder %s2062_s24, %s2780_s13 }
 0x48f   : > { %p2064_p11 = scmp.ne.s32.totalorder %s2062_s24, %s2063_s27  ;;  %p2069_p5 = scmp.lt.s32.totalorder %s2067_s5, %s2063_s27 }
 0x490   : > { %1231 = vmatpush.bf16.msrb.mxu2 %v1672_v8 }
 0x491   : > { %p2065_p12 = pnand %p2064_p11, %p2428_p13  ;;  %p2070_p6 = por %p2069_p5, %p2068_p0 }
 0x493   : > { %p2066_p1 = pneg %p2065_p12 }
 0x495   : > { %p2071_p8 = pnand %p2070_p6, %p2066_p1 }
 0x4f5   : > { %v988_v10 = vpop.permute.xlu0 %987 }
 0x4f6   : > { %v994_v11 = vsel %vm992_vm8, %v988_v10, 0 }
 0x4f7   : > { %1003 = vmatpush.bf16.msra.mxu3 %v994_v11 }
 0x4fa   : > { %1618 = vmatmul.msk.bf16.vlgmr.msra.gmra.mxu3 %vm956_vm7, %v985_v12 }
 0x4fd   : > { %v1010_v13 = vpop.permute.xlu0 %1009 }
 0x4fe   : > { %v1015_v14 = vsel %vm992_vm8, %v1010_v13, 0 }
 0x4ff   : > { %1024 = vmatpush.bf16.msrb.mxu3 %v1015_v14 }
 0x50a   : > { %1619 = vmatmul.msk.bf16.vlgmr.msrb.gmra.mxu3 %vm956_vm7, %v986_v15 }
 0x57d   : > { %v1005_v17 = vpop.f32.mrf.mxu3 }
 0x585   : > { %v1007_v18 = vpop.f32.mrf.mxu3 }
 0x58d   : > { %v1026_v19 = vpop.f32.mrf.mxu3 }
 0x58e   : > { %1031 = vrot.lane.b32.xlu1 %v1026_v19, %s2187_s19 }
 0x595   : > { %v1028_v20 = vpop.f32.mrf.mxu3 }
 0x600   : > { %v1032_v22 = vpop.permute.xlu1 %1031 }
 0x601   : > { %v1034_v23 = vsel %vm910_vm6, %v1005_v17, %v1032_v22 }
 0x602   : > { %v1035_v24 = vpack.c.bf16 %v1034_v23, %v1034_v23 }
 0x604   : > { %1628 = vmatmul.msk.bf16.vlgmr.msrb.gmra.mxu0 %vm824_vm1, %v1035_v24 }
 0x681   : > { %v1064_v26 = vpop.f32.mrf.mxu0 }
 0x682   : > { %v1068_v27 = vadd.f32 %v1064_v26, %v2555_v1  ;;  %v1670_v1 = vld [vmem:[%s2538_s8] sm:$0xff] }
 0x683   : > { %1137 = vmatpush.bf16.msrb.mxu1 %v1670_v1 }
 0x684   : > { %v2599_v28 = vadd.f32 %v1828_v25, %v1068_v27 }
 0x686   : > { %v1076_v29 = vsel %vm824_vm1, %v2599_v28, 0.0 }
 0x687   : > { %1077 = vadd.xlane.f32.xlu1 %v1076_v29 }
 0x689   : > { %v1066_v30 = vpop.f32.mrf.mxu0 }
 0x6fa   : > { %v1078_v31 = vpop.xlane.xlu1 %1077 }
 0x6fb   : > { %v1079_v32 = vmul.f32 %v1078_v31, %v2559_v9 }
 0x6fd   : > { %v1080_v33 = vsub.f32 %v2599_v28, %v1079_v32 }
 0x6ff   : > { %v1081_v34 = vmul.f32 %v1080_v33, %v1080_v33 }
 0x701   : > { %v1082_v35 = vsel %vm824_vm1, %v1081_v34, 0.0 }
 0x702   : > { %1083 = vadd.xlane.f32.xlu2 %v1082_v35 }
 0x775   : > { %v1084_v37 = vpop.xlane.xlu2 %1083 }
 0x776   : > { %v1085_v38 = vmul.f32 %v1084_v37, %v2559_v9 }
 0x778   : > { %v1086_v39 = vadd.f32 1e-05, %v1085_v38  ;;  %v1832_v38 = vld [vmem:[%s687_s29] ss:$0 sm:$0xff] }
 0x77a   : > { %1833 = vrsqrt.f32 %v1086_v39  ;;  %vm1093_vm10 = vweird.f32 %v1086_v39 }
 0x780   : > { %v1834_v40 = vpop.eup %1833 }
 0x781   : > { %v1088_v41 = vmul.f32 %v1834_v40, %v1086_v39  ;;  %vm1094_vm9 = vweird.f32 %v1834_v40 }
 0x782   : > { %vm1095_vm11 = vmor %vm1093_vm10, %vm1094_vm9 }
 0x783   : > { %v1089_v42 = vmul.f32 %v1834_v40, %v1088_v41 }
 0x785   : > { %v1090_v43 = vmul.f32 0.5, %v1089_v42 }
 0x787   : > { %v1091_v44 = vsub.f32 1.5, %v1090_v43 }
 0x789   : > { %v1092_v45 = vmul.f32 %v1834_v40, %v1091_v44 }
 0x78b   : > { %v1096_v47 = vsel %vm1095_vm11, %v1834_v40, %v1092_v45 }
 0x78c   : > { %v1097_v9 = vmul.f32 %v1096_v47, %v1080_v33 }
 0x78e   : > { %v1101_v49 = vmul.f32 %v1829_v46, %v1097_v9 }
 0x790   : > { %v1105_v50 = vadd.f32 %v1830_v48, %v1101_v49 }
 0x792   : > { %v1106_v51 = vpack.c.bf16 %v1105_v50, %v1105_v50 }
 0x794   : > { %1637 = vmatmul.msk.bf16.vlgmr.msrb.gmra.mxu1 %vm824_vm1, %v1106_v51 }
 0x811   : > { %v1139_v53 = vpop.f32.mrf.mxu1 }
 0x812   : > { %v1140_v54 = vadd.f32 %v1831_v52, %v1139_v53 }
 0x814   : > { %v1144_v55 = vmul.f32 0.70710677, %v1140_v54  ;;  %v1143_v35 = vmul.f32 0.5, %v1140_v54 }
 0x816   : > { %v1145_v56 = vmul.f32 %v1144_v55, %v1144_v55 }
 0x818   : > { %v1146_v57 = vmin.f32 %v1145_v56, 16.0 }
 0x819   : > { %v1141_v58 = vpop.f32.mrf.mxu1 }
 0x81a   : > { %v1147_v60 = vmul.f32 2.1237322e-06, %v1146_v57  ;;  %v1158_v61 = vmul.f32 3.8918573e-05, %v1146_v57 }
 0x81c   : > { %v1148_v62 = vadd.f32 0.00028619796, %v1147_v60  ;;  %v1159_v63 = vadd.f32 0.001143296, %v1158_v61 }
 0x81e   : > { %v1149_v2 = vmul.f32 %v1148_v62, %v1146_v57  ;;  %v1160_v3 = vmul.f32 %v1159_v63, %v1146_v57 }
 0x820   : > { %v1161_v5 = vadd.f32 0.014752088, %v1160_v3  ;;  %v1150_v6 = vadd.f32 0.0036580483, %v1149_v2 }
 0x822   : > { %v1162_v7 = vmul.f32 %v1161_v5, %v1146_v57  ;;  %v1151_v11 = vmul.f32 %v1150_v6, %v1146_v57 }
 0x824   : > { %v1163_v10 = vadd.f32 0.112945676, %v1162_v7  ;;  %v1152_v14 = vadd.f32 0.05243302, %v1151_v11 }
 0x826   : > { %v1164_v12 = vmul.f32 %v1163_v10, %v1146_v57  ;;  %v1153_v17 = vmul.f32 %v1152_v14, %v1146_v57 }
 0x828   : > { %v1165_v13 = vadd.f32 0.4994258, %v1164_v12  ;;  %v1154_v18 = vadd.f32 0.18741608, %v1153_v17 }
 0x82a   : > { %v1166_v15 = vmul.f32 %v1165_v13, %v1146_v57  ;;  %v1155_v20 = vmul.f32 %v1154_v18, %v1146_v57 }
 0x82c   : > { %v1167_v16 = vadd.f32 1.0, %v1166_v15  ;;  %v1156_v24 = vadd.f32 1.1283791, %v1155_v20 }
 0x82e   : > { %1835 = vrcp.f32 %v1167_v16  ;;  %v1179_v23 = vand.u32 2147483648, %v1167_v16  ;;  %v1177_v26 = vand.u32 2147483647, %v1167_v16  ;;  %vm1173_vm13 = vweird.f32 %v1167_v16 }
 0x82f   : > { %v1157_v30 = vmul.f32 %v1156_v24, %v1144_v55 }
 0x830   : > { %v1180_v29 = vor.u32 1.1754944e-38, %v1179_v23  ;;  %vm1178_vm15 = vcmp.eq.f32.partialorder %v1177_v26, 8.507059e+37 }
 0x834   : > { %v1836_v19 = vpop.eup %1835 }
 0x835   : > { %v1169_v21 = vmul.f32 %v1836_v19, %v1167_v16  ;;  %vm1174_vm12 = vweird.f32 %v1836_v19 }
 0x836   : > { %vm1175_vm14 = vmor %vm1173_vm13, %vm1174_vm12 }
 0x837   : > { %v1170_v22 = vsub.f32 1.0, %v1169_v21 }
 0x839   : > { %v1171_v25 = vmul.f32 %v1836_v19, %v1170_v22 }
 0x83b   : > { %v1172_v27 = vadd.f32 %v1836_v19, %v1171_v25 }
 0x83d   : > { %v1176_v31 = vsel %vm1175_vm14, %v1836_v19, %v1172_v27 }
 0x83e   : > { %v1181_v32 = vsel %vm1178_vm15, %v1180_v29, %v1176_v31 }
 0x83f   : > { %v1182_v33 = vmul.f32 %v1181_v32, %v1157_v30 }
 0x841   : > { %v1638_v34 = vclamps-f32 %v1182_v33, 1.0 }
 0x843   : > { %v1185_v36 = vadd.f32 1.0, %v1638_v34 }
 0x845   : > { %v1186_v1 = vmul.f32 %v1185_v36, %v1143_v35 }
 0x847   : > { %v1187_v37 = vpack.c.bf16 %v1186_v1, %v1186_v1 }
 0x849   : > { %1655 = vmatmul.msk.bf16.vlgmr.msrb.gmra.mxu2 %vm1220_vm0, %v1187_v37 }
 0x8cc   : > { %v1233_v39 = vpop.f32.mrf.mxu2 }
 0x8cd   : > { %v1237_v40 = vadd.f32 %v1233_v39, %v2599_v28 }
 0x8cf   : > { %v1242_v41 = vadd.f32 %v1832_v38, %v1237_v40 }
 0x8d1   : > { %1243 = vst.msk [vmem:[#allocation2] sm:$0xff] %vm824_vm1, %v1242_v41 }
 0x8d2   : > { %1244 = vst.msk [vmem:[%s2549_s25] sm:$0xff] %vm824_vm1, %v1242_v41 }
 0x8d3   : > { %2074 = shalt.err (!%p2071_p8)
}
 0x8d4   : > { %1690 = dma.vmem_to_hbm [thread:$0]  (%p2428_p13), %s1263_s21, 128, %s1265_s4, %s1246_s26   ;;  %v1235_v28 = vpop.f32.mrf.mxu2  ;;  %v1303_v42 = vld [vmem:[%s2551_s2] sm:$0xff] (%p2428_p13)  ;;  %v1305_v43 = vld [vmem:[%s2551_s2 + $0x8] sm:$0xff] (%p2428_p13) }
 0x8d5   : > { %1270 = sbr.rel (!%p2428_p13) target bundleno = 2270 (0x8de), region = 116  ;;  %s2781_s19 = sld [smem:[#allocation47_spill]] (%p2428_p13) }
 0x8db   : > { %s1272_s7 = scalar_lea.vmem %s2781_s19, %s1658_s22 }
 0x8dc   : > { %1304 = vst [vmem:[%s1272_s7] sm:$0xff] %v1303_v42 }
 0x8dd   : > { %1306 = vst [vmem:[%s1272_s7 + $0x10] sm:$0xff] %v1305_v43 }
 0x8de PF: > { %s2782_s18 = sld [smem:[#allocation23_spill]]  ;;  %p1719_p2 = scmp.ge.s32.totalorder %s2181_s23, 2 }
 0x8e0   : > { %p1715_p9 = pnand %p1719_p2, %p2435_p3 }
 0x8e2   : > { %p1716_p13 = pneg %p1715_p9 }
 0x8e4   : > { %s1318_s8 = sand.u32 1, %s2782_s18  }
 0x8e5   : > { %s1319_s3 = scalar_lea.sflag [#allocation5], %s1318_s8 }
 0x8e6   : > { %2136 = dma.done.wait (%p1716_p13), %s1319_s3, 128  }
 0x8e7   : > { %2138 = vsyncadd (%p1716_p13), %s1319_s3, 4294967168  ;;  %s40_s23 = sadd.s32 1, %s2181_s23   ;;  %s2784_s2 = sld [smem:[#allocation22_spill]] }
 0x8e8   : > { %p37_p4 = scmp.ge.s32.totalorder %s40_s23, 6   ;;  %s2785_s15 = sld [smem:[#allocation30_spill]] }
 0x8e9   : > { %s2786_s9 = sld [smem:[#allocation24_spill]]  ;;  %s2792_s29 = smov %s2145_s30 }
 0x8ea   : > { %s2787_s18 = sld [smem:[#allocation31_spill]]  ;;  %s2794_s16 = smov %s2157_s17 }
 0x8eb   : > { %s2788_s19 = sld [smem:[#allocation26_spill]]  ;;  %39 = sbr.rel (!%p37_p4) target bundleno = 31 (0x1f), region = 265 }
 0x8ec   : > { %s2789_s20 = sld [smem:[#allocation27_spill]] }
 0x8ed   : > { %s2790_s21 = sld [smem:[#allocation28_spill]]  ;;  %s2793_s30 = smov %s2784_s2 }
 0x8ee   : > { %s2791_s22 = sld [smem:[#allocation29_spill]] }
 0x8ef   : > { %s2795_s17 = smov %s2786_s9 }
 0x8f0   :  { %1332 = vsyncpa [#allocation4], 1 }
 0x8f1   :  { %1334 = vsyncpa [#allocation4 + $0x1], 1 }
 0x8f2   :  { %1335 = vsyncpa [#allocation7], 1 }
 0x8f3   :  { %1337 = vsyncpa [#allocation7 + $0x1], 1 }
 0x8f4   :  { %1338 = vsyncpa [#allocation10], 1 }
 0x8f5   :  { %1340 = vsyncpa [#allocation10 + $0x1], 1 }
 0x8f6   :  { %1341 = vsyncpa [#allocation13], 1 }
 0x8f7   :  { %1343 = vsyncpa [#allocation13 + $0x1], 1 }
 0x8f8   :  { %1344 = vsyncpa [#allocation5], 1 }
 0x8f9   :  { %1346 = vsyncpa [#allocation5 + $0x1], 1 }

</bundles_post_ra>
